<compile_context>
chip_gen: v7x
topology: tpu7x:2x2x1
jax: 0.10.0
libtpu: 0.0.40
codegen_flags: <defaults>
</compile_context>

<pallas_src>
import functools

import jax
import jax.numpy as jnp
from jax import lax
from jax.experimental import pallas as pl
from jax.experimental.pallas import tpu as pltpu


def abmil_kernel(x_ref, w1_ref, b1_ref, w2_ref, b2_ref, w3_ref, wc_ref, bc_ref,
                 out_ref, m_sc, l_sc, z_sc, *, n_total):
    i = pl.program_id(0)
    tn = x_ref.shape[0]

    @pl.when(i == 0)
    def _init():
        m_sc[...] = jnp.full_like(m_sc, -jnp.inf)
        l_sc[...] = jnp.zeros_like(l_sc)
        z_sc[...] = jnp.zeros_like(z_sc)

    # Valid-row mask for the (possibly padded) last tile.
    row = lax.broadcasted_iota(jnp.int32, (tn, 1), 0) + i * tn
    valid = row < n_total                                             # (tn, 1)

    x = x_ref[...]                                                    # (tn, C)

    # fc1 -> ReLU   (dropout1 is identity in eval mode)
    # TODO(synk): for very small C (e.g. 4) this could be unrolled VPU
    # rank-1 multiply-adds instead of an MXU matmul with tiny K.
    h = jnp.dot(x, w1_ref[...], preferred_element_type=jnp.float32)
    h = jnp.maximum(h + b1_ref[...], 0.0)                             # (tn, E)

    # fc2 -> tanh   (dropout2 is identity in eval mode)
    a = jnp.dot(h, w2_ref[...], preferred_element_type=jnp.float32)
    a = jnp.tanh(a + b2_ref[...])                                     # (tn, H)

    # fc3 (no bias): VPU multiply + lane reduce (avoids lane-width-1 MXU op).
    s = jnp.sum(a * w3_ref[...], axis=-1, keepdims=True)              # (tn, 1)
    s = jnp.where(valid, s, -jnp.inf)

    # Online softmax over instances + attention-weighted pooling.
    m_prev = m_sc[...]
    m_new = jnp.maximum(m_prev, jnp.max(s, axis=0, keepdims=True))    # (1, 1)
    alpha = jnp.exp(m_prev - m_new)                                   # (1, 1)
    p = jnp.where(valid, jnp.exp(s - m_new), 0.0)                     # (tn, 1)
    h_z = jnp.where(valid, h, 0.0)                                    # (tn, E)

    l_sc[...] = alpha * l_sc[...] + jnp.sum(p, axis=0, keepdims=True)
    # Pooling as an MXU contraction over the instance axis: (1,tn)@(tn,E).
    z_sc[...] = alpha * z_sc[...] + lax.dot_general(
        p, h_z, (((0,), (0,)), ((), ())),
        preferred_element_type=jnp.float32)                           # (1, E)
    m_sc[...] = m_new

    @pl.when(i == pl.num_programs(0) - 1)
    def _finalize():
        z = z_sc[...] * pl.reciprocal(l_sc[...], approx=False)        # (1, E)
        logits = jnp.dot(z, wc_ref[...], preferred_element_type=jnp.float32)
        out_ref[...] = (logits + bc_ref[...]).astype(out_ref.dtype)


def abmil_forward(x, params, tile_n=256):
    """Runs the full ABMIL forward pass for one bag x of shape (N, C)."""
    w1, b1, w2, b2, w3, wc, bc = params
    N, C = x.shape
    E = w1.shape[1]
    H = w2.shape[1]
    NC = wc.shape[1]
    w3_row = jnp.reshape(jnp.transpose(w3), (1, H))   # (H,1) -> (1,H) for VPU path

    if N <= tile_n:
        tn = N                       # full-extent block is always legal
    else:
        assert tile_n % 8 == 0, "tile_n must be sublane-aligned"
        tn = tile_n
    grid = (pl.cdiv(N, tn),)

    def const2d(shape):
        return pl.BlockSpec(shape, lambda i: (0, 0))   # weights stay VMEM-resident

    out = pl.pallas_call(
        functools.partial(abmil_kernel, n_total=N),
        out_shape=jax.ShapeDtypeStruct((1, NC), jnp.float32),
        grid_spec=pltpu.PrefetchScalarGridSpec(
            num_scalar_prefetch=0,
            grid=grid,
            in_specs=[
                pl.BlockSpec((tn, C), lambda i: (i, 0)),   # streamed x tiles
                const2d(w1.shape), const2d(b1.shape),
                const2d(w2.shape), const2d(b2.shape),
                const2d(w3_row.shape),
                const2d(wc.shape), const2d(bc.shape),
            ],
            out_specs=pl.BlockSpec((1, NC), lambda i: (0, 0)),
            scratch_shapes=[
                pltpu.VMEM((1, 1), jnp.float32),   # running max m
                pltpu.VMEM((1, 1), jnp.float32),   # running denominator l
                pltpu.VMEM((1, E), jnp.float32),   # running weighted sum z
            ],
        ),
        compiler_params=pltpu.CompilerParams(
            dimension_semantics=("arbitrary",),          # N is a reduction axis
            vmem_limit_bytes=32 * 1024 * 1024,           # safe on v5e/v6e/v7x
        ),
    )(x, w1, b1, w2, b2, w3_row, wc, bc)
    return out[0]  # (num_classes,), matching the torch module's 1-D logits


def make_params(key, C, embed_dim, hidden, num_classes):
    ks = jax.random.split(key, 7)
    scale = 0.05
    w1 = scale * jax.random.normal(ks[0], (C, embed_dim), jnp.float32)
    b1 = scale * jax.random.normal(ks[1], (1, embed_dim), jnp.float32)
    w2 = scale * jax.random.normal(ks[2], (embed_dim, hidden), jnp.float32)
    b2 = scale * jax.random.normal(ks[3], (1, hidden), jnp.float32)
    w3 = scale * jax.random.normal(ks[4], (hidden, 1), jnp.float32)
    wc = scale * jax.random.normal(ks[5], (embed_dim, num_classes), jnp.float32)
    bc = scale * jax.random.normal(ks[6], (1, num_classes), jnp.float32)
    return (w1, b1, w2, b2, w3, wc, bc)


if __name__ == "__main__":
    # Bag of N=200 instances with C=4 features each; embed_dim=32, hidden=32,
    # 2 classes. tile_n=64 forces a multi-tile grid with a partial last tile,
    # exercising the online-softmax streaming and masking paths.
    N, C, E, H, NC = 200, 4, 32, 32, 2

    key = jax.random.PRNGKey(0)
    kx, kp = jax.random.split(key)
    x = jax.random.normal(kx, (N, C), jnp.float32)
    params = make_params(kp, C, E, H, NC)

    logits = abmil_forward(x, params, tile_n=64)
    jax.block_until_ready(logits)

    # Pure-JAX reference check (dropout is identity in eval mode).
    w1, b1, w2, b2, w3, wc, bc = params
    h = jnp.maximum(x @ w1 + b1, 0.0)
    a = jnp.tanh(h @ w2 + b2)
    s = a @ w3
    wsm = jax.nn.softmax(s, axis=0)
    z = jnp.sum(wsm * h, axis=0)
    ref = z @ wc + bc[0]
    assert jnp.allclose(logits, ref, atol=1e-5, rtol=1e-5), (logits, ref)

    print("KERNEL_OK")
</pallas_src>

<mosaic_0001>
module attributes {stable_mosaic.version = 11 : i64} {
  func.func @abmil_kernel(%arg0: i32, %arg1: memref<64x4xf32, #tpu.memory_space<vmem>>, %arg2: memref<4x32xf32, #tpu.memory_space<vmem>>, %arg3: memref<1x32xf32, #tpu.memory_space<vmem>>, %arg4: memref<32x32xf32, #tpu.memory_space<vmem>>, %arg5: memref<1x32xf32, #tpu.memory_space<vmem>>, %arg6: memref<1x32xf32, #tpu.memory_space<vmem>>, %arg7: memref<32x2xf32, #tpu.memory_space<vmem>>, %arg8: memref<1x2xf32, #tpu.memory_space<vmem>>, %arg9: memref<1x2xf32, #tpu.memory_space<vmem>>, %arg10: memref<1x1xf32, #tpu.memory_space<vmem>>, %arg11: memref<1x1xf32, #tpu.memory_space<vmem>>, %arg12: memref<1x32xf32, #tpu.memory_space<vmem>>) attributes {dimension_semantics = [#tpu.dimension_semantics<arbitrary>], iteration_bounds = array<i64: 4>, scalar_prefetch = 0 : i64, scratch_operands = 3 : i64, tpu.core_type = #tpu.core_type<tc>, window_params = [{transform_indices = @transform_0, window_bounds = array<i64: 64, 4>}, {pipeline_mode = #tpu.pipeline_mode<synchronous>, transform_indices = @transform_1, window_bounds = array<i64: 4, 32>}, {pipeline_mode = #tpu.pipeline_mode<synchronous>, transform_indices = @transform_2, window_bounds = array<i64: 1, 32>}, {pipeline_mode = #tpu.pipeline_mode<synchronous>, transform_indices = @transform_3, window_bounds = array<i64: 32, 32>}, {pipeline_mode = #tpu.pipeline_mode<synchronous>, transform_indices = @transform_4, window_bounds = array<i64: 1, 32>}, {pipeline_mode = #tpu.pipeline_mode<synchronous>, transform_indices = @transform_5, window_bounds = array<i64: 1, 32>}, {pipeline_mode = #tpu.pipeline_mode<synchronous>, transform_indices = @transform_6, window_bounds = array<i64: 32, 2>}, {pipeline_mode = #tpu.pipeline_mode<synchronous>, transform_indices = @transform_7, window_bounds = array<i64: 1, 2>}, {pipeline_mode = #tpu.pipeline_mode<synchronous>, transform_indices = @transform_8, window_bounds = array<i64: 1, 2>}]} {
    %c0_i32 = arith.constant 0 : i32
    %0 = arith.cmpi eq, %arg0, %c0_i32 : i32
    %1 = arith.extui %0 : i1 to i32
    %c0_i32_0 = arith.constant 0 : i32
    %2 = arith.cmpi ne, %1, %c0_i32_0 : i32
    scf.if %2 {
      %cst_34 = arith.constant 0xFF800000 : f32
      %61 = vector.broadcast %cst_34 : f32 to vector<1x1xf32>
      %c0_35 = arith.constant 0 : index
      %c0_36 = arith.constant 0 : index
      %62 = vector.load %arg10[%c0_35, %c0_36] : memref<1x1xf32, #tpu.memory_space<vmem>>, vector<1x1xf32>
      tpu.vector_store %arg10[%c0_35, %c0_36], %61 {strides = array<i32>} : memref<1x1xf32, #tpu.memory_space<vmem>>, vector<1x1xf32>,
      %cst_37 = arith.constant 0.000000e+00 : f32
      %63 = vector.broadcast %cst_37 : f32 to vector<1x1xf32>
      %c0_38 = arith.constant 0 : index
      %c0_39 = arith.constant 0 : index
      %64 = vector.load %arg11[%c0_38, %c0_39] : memref<1x1xf32, #tpu.memory_space<vmem>>, vector<1x1xf32>
      tpu.vector_store %arg11[%c0_38, %c0_39], %63 {strides = array<i32>} : memref<1x1xf32, #tpu.memory_space<vmem>>, vector<1x1xf32>,
      %cst_40 = arith.constant 0.000000e+00 : f32
      %65 = vector.broadcast %cst_40 : f32 to vector<1x32xf32>
      %c0_41 = arith.constant 0 : index
      %c0_42 = arith.constant 0 : index
      %66 = vector.load %arg12[%c0_41, %c0_42] : memref<1x32xf32, #tpu.memory_space<vmem>>, vector<1x32xf32>
      tpu.vector_store %arg12[%c0_41, %c0_42], %65 {strides = array<i32>} : memref<1x32xf32, #tpu.memory_space<vmem>>, vector<1x32xf32>,
    } else {
    }
    %3 = tpu.iota {dimensions = array<i32: 0>} : vector<64x1xi32>
    %c64_i32 = arith.constant 64 : i32
    %4 = arith.muli %arg0, %c64_i32 : i32
    %5 = vector.broadcast %4 : i32 to vector<64x1xi32>
    %6 = arith.addi %3, %5 : vector<64x1xi32>
    %c200_i32 = arith.constant 200 : i32
    %7 = vector.broadcast %c200_i32 : i32 to vector<64x1xi32>
    %8 = arith.cmpi slt, %6, %7 : vector<64x1xi32>
    %c0 = arith.constant 0 : index
    %c0_1 = arith.constant 0 : index
    %9 = vector.load %arg1[%c0, %c0_1] : memref<64x4xf32, #tpu.memory_space<vmem>>, vector<64x4xf32>
    %c0_2 = arith.constant 0 : index
    %c0_3 = arith.constant 0 : index
    %10 = vector.load %arg2[%c0_2, %c0_3] : memref<4x32xf32, #tpu.memory_space<vmem>>, vector<4x32xf32>
    %cst = arith.constant dense<0.000000e+00> : vector<64x32xf32>
    %11 = tpu.matmul %9, %10, %cst {dimension_numbers = #tpu.dot_dimension_numbers<[1], [0], [0], [1], [0, 0, 1, 1], [], []>} : vector<64x4xf32>, vector<4x32xf32>, vector<64x32xf32> -> vector<64x32xf32>
    %c0_4 = arith.constant 0 : index
    %c0_5 = arith.constant 0 : index
    %12 = vector.load %arg3[%c0_4, %c0_5] : memref<1x32xf32, #tpu.memory_space<vmem>>, vector<1x32xf32>
    %13 = vector.broadcast %12 : vector<1x32xf32> to vector<64x32xf32>
    %14 = arith.addf %11, %13 : vector<64x32xf32>
    %cst_6 = arith.constant 0.000000e+00 : f32
    %15 = vector.broadcast %cst_6 : f32 to vector<64x32xf32>
    %16 = arith.maximumf %14, %15 : vector<64x32xf32>
    %c0_7 = arith.constant 0 : index
    %c0_8 = arith.constant 0 : index
    %17 = vector.load %arg4[%c0_7, %c0_8] : memref<32x32xf32, #tpu.memory_space<vmem>>, vector<32x32xf32>
    %cst_9 = arith.constant dense<0.000000e+00> : vector<64x32xf32>
    %18 = tpu.matmul %16, %17, %cst_9 {dimension_numbers = #tpu.dot_dimension_numbers<[1], [0], [0], [1], [0, 0, 1, 1], [], []>} : vector<64x32xf32>, vector<32x32xf32>, vector<64x32xf32> -> vector<64x32xf32>
    %c0_10 = arith.constant 0 : index
    %c0_11 = arith.constant 0 : index
    %19 = vector.load %arg5[%c0_10, %c0_11] : memref<1x32xf32, #tpu.memory_space<vmem>>, vector<1x32xf32>
    %20 = vector.broadcast %19 : vector<1x32xf32> to vector<64x32xf32>
    %21 = arith.addf %18, %20 : vector<64x32xf32>
    %22 = math.tanh %21 : vector<64x32xf32>
    %c0_12 = arith.constant 0 : index
    %c0_13 = arith.constant 0 : index
    %23 = vector.load %arg6[%c0_12, %c0_13] : memref<1x32xf32, #tpu.memory_space<vmem>>, vector<1x32xf32>
    %24 = vector.broadcast %23 : vector<1x32xf32> to vector<64x32xf32>
    %25 = arith.mulf %22, %24 : vector<64x32xf32>
    %cst_14 = arith.constant dense<0.000000e+00> : vector<64xf32>
    %26 = vector.multi_reduction <add>, %25, %cst_14 [1] : vector<64x32xf32> to vector<64xf32>
    %27 = vector.shape_cast %26 : vector<64xf32> to vector<64x1xf32>
    %cst_15 = arith.constant 0xFF800000 : f32
    %28 = vector.broadcast %cst_15 : f32 to vector<64x1xf32>
    %29 = arith.select %8, %27, %28 : vector<64x1xi1>, vector<64x1xf32>
    %c0_16 = arith.constant 0 : index
    %c0_17 = arith.constant 0 : index
    %30 = vector.load %arg10[%c0_16, %c0_17] : memref<1x1xf32, #tpu.memory_space<vmem>>, vector<1x1xf32>
    %cst_18 = arith.constant dense<0xFF800000> : vector<1xf32>
    %31 = vector.multi_reduction <maximumf>, %29, %cst_18 [0] : vector<64x1xf32> to vector<1xf32>
    %32 = vector.shape_cast %31 : vector<1xf32> to vector<1x1xf32>
    %33 = arith.maximumf %30, %32 : vector<1x1xf32>
    %34 = arith.subf %30, %33 : vector<1x1xf32>
    %35 = math.exp %34 : vector<1x1xf32>
    %36 = vector.broadcast %33 : vector<1x1xf32> to vector<64x1xf32>
    %37 = arith.subf %29, %36 : vector<64x1xf32>
    %38 = math.exp %37 : vector<64x1xf32>
    %cst_19 = arith.constant 0.000000e+00 : f32
    %39 = vector.broadcast %cst_19 : f32 to vector<64x1xf32>
    %40 = arith.select %8, %38, %39 : vector<64x1xi1>, vector<64x1xf32>
    %cst_20 = arith.constant 0.000000e+00 : f32
    %41 = vector.shape_cast %8 : vector<64x1xi1> to vector<64x1xi1>
    %42 = vector.broadcast %41 : vector<64x1xi1> to vector<64x32xi1>
    %43 = vector.broadcast %cst_20 : f32 to vector<64x32xf32>
    %44 = arith.select %42, %16, %43 : vector<64x32xi1>, vector<64x32xf32>
    %c0_21 = arith.constant 0 : index
    %c0_22 = arith.constant 0 : index
    %45 = vector.load %arg11[%c0_21, %c0_22] : memref<1x1xf32, #tpu.memory_space<vmem>>, vector<1x1xf32>
    %46 = arith.mulf %35, %45 : vector<1x1xf32>
    %cst_23 = arith.constant dense<0.000000e+00> : vector<1xf32>
    %47 = vector.multi_reduction <add>, %40, %cst_23 [0] : vector<64x1xf32> to vector<1xf32>
    %48 = vector.shape_cast %47 : vector<1xf32> to vector<1x1xf32>
    %49 = arith.addf %46, %48 : vector<1x1xf32>
    %c0_24 = arith.constant 0 : index
    %c0_25 = arith.constant 0 : index
    %50 = vector.load %arg11[%c0_24, %c0_25] : memref<1x1xf32, #tpu.memory_space<vmem>>, vector<1x1xf32>
    tpu.vector_store %arg11[%c0_24, %c0_25], %49 {strides = array<i32>} : memref<1x1xf32, #tpu.memory_space<vmem>>, vector<1x1xf32>,
    %c0_26 = arith.constant 0 : index
    %c0_27 = arith.constant 0 : index
    %51 = vector.load %arg12[%c0_26, %c0_27] : memref<1x32xf32, #tpu.memory_space<vmem>>, vector<1x32xf32>
    %52 = vector.broadcast %35 : vector<1x1xf32> to vector<1x32xf32>
    %53 = arith.mulf %52, %51 : vector<1x32xf32>
    %cst_28 = arith.constant dense<0.000000e+00> : vector<1x32xf32>
    %54 = tpu.matmul %40, %44, %cst_28 {dimension_numbers = #tpu.dot_dimension_numbers<[0], [0], [1], [1], [0, 1, 1, 1], [], []>} : vector<64x1xf32>, vector<64x32xf32>, vector<1x32xf32> -> vector<1x32xf32>
    %55 = arith.addf %53, %54 : vector<1x32xf32>
    %c0_29 = arith.constant 0 : index
    %c0_30 = arith.constant 0 : index
    %56 = vector.load %arg12[%c0_29, %c0_30] : memref<1x32xf32, #tpu.memory_space<vmem>>, vector<1x32xf32>
    tpu.vector_store %arg12[%c0_29, %c0_30], %55 {strides = array<i32>} : memref<1x32xf32, #tpu.memory_space<vmem>>, vector<1x32xf32>,
    %c0_31 = arith.constant 0 : index
    %c0_32 = arith.constant 0 : index
    %57 = vector.load %arg10[%c0_31, %c0_32] : memref<1x1xf32, #tpu.memory_space<vmem>>, vector<1x1xf32>
    tpu.vector_store %arg10[%c0_31, %c0_32], %33 {strides = array<i32>} : memref<1x1xf32, #tpu.memory_space<vmem>>, vector<1x1xf32>,
    %c3_i32 = arith.constant 3 : i32
    %58 = arith.cmpi eq, %arg0, %c3_i32 : i32
    %59 = arith.extui %58 : i1 to i32
    %c0_i32_33 = arith.constant 0 : i32
    %60 = arith.cmpi ne, %59, %c0_i32_33 : i32
    scf.if %60 {
      %c0_34 = arith.constant 0 : index
      %c0_35 = arith.constant 0 : index
      %61 = vector.load %arg12[%c0_34, %c0_35] : memref<1x32xf32, #tpu.memory_space<vmem>>, vector<1x32xf32>
      %c0_36 = arith.constant 0 : index
      %c0_37 = arith.constant 0 : index
      %62 = vector.load %arg11[%c0_36, %c0_37] : memref<1x1xf32, #tpu.memory_space<vmem>>, vector<1x1xf32>
      %63 = tpu.reciprocal %62 : vector<1x1xf32> -> vector<1x1xf32>
      %64 = vector.broadcast %63 : vector<1x1xf32> to vector<1x32xf32>
      %65 = arith.mulf %61, %64 : vector<1x32xf32>
      %c0_38 = arith.constant 0 : index
      %c0_39 = arith.constant 0 : index
      %66 = vector.load %arg7[%c0_38, %c0_39] : memref<32x2xf32, #tpu.memory_space<vmem>>, vector<32x2xf32>
      %cst_40 = arith.constant dense<0.000000e+00> : vector<1x2xf32>
      %67 = tpu.matmul %65, %66, %cst_40 {dimension_numbers = #tpu.dot_dimension_numbers<[1], [0], [0], [1], [0, 0, 1, 1], [], []>} : vector<1x32xf32>, vector<32x2xf32>, vector<1x2xf32> -> vector<1x2xf32>
      %c0_41 = arith.constant 0 : index
      %c0_42 = arith.constant 0 : index
      %68 = vector.load %arg8[%c0_41, %c0_42] : memref<1x2xf32, #tpu.memory_space<vmem>>, vector<1x2xf32>
      %69 = arith.addf %67, %68 : vector<1x2xf32>
      %c0_43 = arith.constant 0 : index
      %c0_44 = arith.constant 0 : index
      %70 = vector.load %arg9[%c0_43, %c0_44] : memref<1x2xf32, #tpu.memory_space<vmem>>, vector<1x2xf32>
      tpu.vector_store %arg9[%c0_43, %c0_44], %69 {strides = array<i32>} : memref<1x2xf32, #tpu.memory_space<vmem>>, vector<1x2xf32>,
    } else {
    }
    return
  }
  func.func @transform_0(%arg0: i32) -> (i32, i32) {
    %c0_i32 = arith.constant 0 : i32
    %c0_i32_0 = arith.constant 0 : i32
    return %arg0, %c0_i32 : i32, i32
  }
  func.func @transform_1(%arg0: i32) -> (i32, i32) {
    %c0_i32 = arith.constant 0 : i32
    %c0_i32_0 = arith.constant 0 : i32
    %c0_i32_1 = arith.constant 0 : i32
    return %c0_i32, %c0_i32_0 : i32, i32
  }
  func.func @transform_2(%arg0: i32) -> (i32, i32) {
    %c0_i32 = arith.constant 0 : i32
    %c0_i32_0 = arith.constant 0 : i32
    %c0_i32_1 = arith.constant 0 : i32
    return %c0_i32, %c0_i32_0 : i32, i32
  }
  func.func @transform_3(%arg0: i32) -> (i32, i32) {
    %c0_i32 = arith.constant 0 : i32
    %c0_i32_0 = arith.constant 0 : i32
    %c0_i32_1 = arith.constant 0 : i32
    return %c0_i32, %c0_i32_0 : i32, i32
  }
  func.func @transform_4(%arg0: i32) -> (i32, i32) {
    %c0_i32 = arith.constant 0 : i32
    %c0_i32_0 = arith.constant 0 : i32
    %c0_i32_1 = arith.constant 0 : i32
    return %c0_i32, %c0_i32_0 : i32, i32
  }
  func.func @transform_5(%arg0: i32) -> (i32, i32) {
    %c0_i32 = arith.constant 0 : i32
    %c0_i32_0 = arith.constant 0 : i32
    %c0_i32_1 = arith.constant 0 : i32
    return %c0_i32, %c0_i32_0 : i32, i32
  }
  func.func @transform_6(%arg0: i32) -> (i32, i32) {
    %c0_i32 = arith.constant 0 : i32
    %c0_i32_0 = arith.constant 0 : i32
    %c0_i32_1 = arith.constant 0 : i32
    return %c0_i32, %c0_i32_0 : i32, i32
  }
  func.func @transform_7(%arg0: i32) -> (i32, i32) {
    %c0_i32 = arith.constant 0 : i32
    %c0_i32_0 = arith.constant 0 : i32
    %c0_i32_1 = arith.constant 0 : i32
    return %c0_i32, %c0_i32_0 : i32, i32
  }
  func.func @transform_8(%arg0: i32) -> (i32, i32) {
    %c0_i32 = arith.constant 0 : i32
    %c0_i32_0 = arith.constant 0 : i32
    %c0_i32_1 = arith.constant 0 : i32
    return %c0_i32, %c0_i32_0 : i32, i32
  }
}

</mosaic_0001>

<bundles_post_ra>
// kernel: tpu_custom_call.1
= control target key start
LH: loop header
LB: loop body
LE: loop exit
PB: predicated region body
PF: predicated region fallthrough
CT: control target
= control target key end

     0   :  { %13 = vsyncpa [#allocation6], 0  ;;  %s1405_s27 = smov 0   ;;  %s1626_s0 = inlined_call_operand.vmem [shape: f32[200,4], index: 0, kind: input, shape index: {}]   ;;  %s1627_s1 = inlined_call_operand.vmem [shape: f32[4,32], index: 1, kind: input, shape index: {}]   ;;  %s1628_s2 = inlined_call_operand.vmem [shape: f32[1,32], index: 2, kind: input, shape index: {}]   ;;  %s1629_s3 = inlined_call_operand.vmem [shape: f32[32,32], index: 3, kind: input, shape index: {}]   ;;  %s1630_s4 = inlined_call_operand.vmem [shape: f32[1,32], index: 4, kind: input, shape index: {}]   ;;  %s1631_s5 = inlined_call_operand.vmem [shape: f32[1,32], index: 5, kind: input, shape index: {}]   ;;  %s1632_s6 = inlined_call_operand.vmem [shape: f32[32,2], index: 6, kind: input, shape index: {}]   ;;  %s1633_s7 = inlined_call_operand.vmem [shape: f32[1,2], index: 7, kind: input, shape index: {}]   ;;  %s1634_s8 = inlined_call_operand.hbm [shape: f32[1,2], index: 8, kind: output, shape index: {}]  }
   0x1 LB: > { %s1411_s28 = sadd.s32 4294967295, %s1347_s27   ;;  %p1078_p0 = scmp.ge.s32.totalorder %s1347_s27, 1  ;;  %s1347_s27 = sphi %s1405_s27, %s19_s27  }
   0x2   : > { %p267_p1 = scmp.lt.s32.totalorder %s1347_s27, 5 }
   0x4   : > { %p268_p2 = pnand %p1078_p0, %p267_p1 }
   0x5   : > { %s1079_s29 = sshll.u32 (!%p268_p2), %s1411_s28, 3  ;;  %p1081_p4 = scmp.ne.s32.totalorder (!%p268_p2), %s1411_s28, 0 }
   0x6   : > { %271 = sbr.rel (%p268_p2) target bundleno = 1259 (0x4eb), region = 52  ;;  %p305_p3 = scmp.lt.s32.totalorder (!%p268_p2), %s1079_s29, 24 }
   0xd   : > { %s1636_s29 = smov (!%p305_p3, %s1079_s29), 24  ;;  %317 = sbr.rel (%p1081_p4) target bundleno = 20 (0x14), region = 56 }
   0xe   : > { %s1080_s30 = sshll.u32 %s1636_s29, 3  ;;  %vm318_vm0 = vcmask (!%p1081_p4), 0   ;;  %vm321_vm1 = vcmask (!%p1081_p4), 253952   ;;  %v1349_v0 = vmov (!%p1081_p4), -inf   ;;  %v1350_v1 = vmov (!%p1081_p4), 0.0  }
   0xf   : > { %s1419_s11 = scalar_lea.vmem %s1626_s0, %s1080_s30  ;;  %319 = vst.msk [vmem:[#allocation2] sm:$0x1] (!%p1081_p4), %vm318_vm0, %v1349_v0  ;;  %320 = vst.msk [vmem:[#allocation3] sm:$0x1] (!%p1081_p4), %vm318_vm0, %v1350_v1 }
  0x10   : > { %322 = vst.msk [vmem:[#allocation4] sm:$0x1] (!%p1081_p4), %vm321_vm1, %v1350_v1 }
  0x14 PF: > { %v358_v2 = vld [vmem:[%s1627_s1] sm:$0xf]  ;;  %vm391_vm2 = vcmask 1043456   ;;  %vm366_vm3 = vcmask 31744   ;;  %v351_v4 = vld [vmem:[%s1419_s11 + $0x8] sm:$0xff]  ;;  %v352_v5 = vld [vmem:[%s1419_s11 + $0x10] sm:$0xff]  ;;  %v323_v18 = vlaneseq }
  0x15   : > { %v350_v3 = vld [vmem:[%s1419_s11] sm:$0xff]  ;;  %1153 = vmatprep.subr.msk.mxu0 %vm391_vm2, %v358_v2  ;;  %v509_v7 = vld [vmem:[%s1629_s3 + $0x8] sm:$0xff]  ;;  %v353_v8 = vld [vmem:[%s1419_s11 + $0x18] sm:$0xff]  ;;  %v1351_v17 = vmov 0.0|0.0   ;;  %s1082_s22 = sshll.u32 %s1411_s28, 6  ;;  %vm519_vm6 = vcmask 261120  }
  0x16   : > { %1155 = vmatprep.mubr.msk.f32.mxu0 %vm366_vm3, %v350_v3  ;;  %1154 = vmatpush3.msk.msra.mxu0 %vm391_vm2, %v358_v2  ;;  %v508_v6 = vld [vmem:[%s1629_s3] sm:$0xff]  ;;  %v355_v11 = vld [vmem:[%s1419_s11 + $0x28] sm:$0xff]  ;;  %v356_v12 = vld [vmem:[%s1419_s11 + $0x30] sm:$0xff]  ;;  %v1454_v19 = vshrl.u32 %v323_v18, 7  ;;  %v333_v21 = vstv %s1082_s22  ;;  %vm809_vm1 = vcmask 0   ;;  %vm786_vm2 = vcmask 7168  }
  0x17   : > { %1156 = vmatmul.mubr.msk.f32.vlgmr.msra.gmra.mrb[0].mxu0 %vm366_vm3, %v351_v4  ;;  %v1217_v9 = vpack.c.bf16 %v509_v7, %v508_v6  ;;  %v354_v10 = vld [vmem:[%s1419_s11 + $0x20] sm:$0xff]  ;;  %v357_v13 = vld [vmem:[%s1419_s11 + $0x38] sm:$0xff]  ;;  %v510_v14 = vld [vmem:[%s1629_s3 + $0x10] sm:$0xff]  ;;  %1225 = vmatprep.subr.bf16.mxu0 %v1351_v17  ;;  %p1112_p5 = scmp.ne.s32.totalorder %s1411_s28, 3 }
  0x18   : > { %1158 = vmatprep.mubr.msk.f32.mxu0 %vm366_vm3, %v352_v5  ;;  %v511_v15 = vld [vmem:[%s1629_s3 + $0x18] sm:$0xff]  ;;  %v325_v20 = vadd.s32 8, %v1454_v19  ;;  %v326_v22 = vadd.s32 16, %v1454_v19  ;;  %v327_v23 = vadd.s32 24, %v1454_v19  ;;  %v1083_v24 = vld [vmem:[%s1628_s2] ss:$0 sm:$0xff]  ;;  %v1464_v25 = vadd.s32 %v333_v21, %v1454_v19 }
  0x19   : > { %1218 = vmatprep.subr.bf16.mxu1 %v1217_v9  ;;  %v1221_v16 = vpack.c.bf16 %v511_v15, %v510_v14  ;;  %v328_v32 = vadd.s32 32, %v1454_v19  ;;  %v329_v33 = vadd.s32 40, %v1454_v19  ;;  %v330_v44 = vadd.s32 48, %v1454_v19  ;;  %v1093_v1 = vld [vmem:[%s1630_s4] ss:$0 sm:$0xff] }
  0x1a   : > { %1220 = vmatpush3.bf16.msra.mxu1 %v1217_v9  ;;  %v1466_v26 = vadd.s32 %v333_v21, %v325_v20  ;;  %v1468_v28 = vadd.s32 %v333_v21, %v326_v22  ;;  %v1470_v31 = vadd.s32 %v333_v21, %v327_v23  ;;  %vm342_vm4 = vcmp.lt.s32.totalorder %v1464_v25, 200  ;;  %v1102_v14 = vld [vmem:[%s1631_s5] ss:$0 sm:$0xff] }
  0x1b   : > { %1159 = vmatmul.mubr.msk.f32.gmra.mrb[2].mxu0 %vm366_vm3, %v353_v8  ;;  %1222 = vmatprep.subr.bf16.mxu1 %v1221_v16  ;;  %v1482_v40 = vadd.s32 %v333_v21, %v328_v32  ;;  %v1484_v41 = vadd.s32 %v333_v21, %v329_v33  ;;  %v331_v45 = vadd.s32 56, %v1454_v19  ;;  %v1498_v53 = vadd.s32 %v333_v21, %v330_v44 }
  0x1c   : > { %1161 = vmatprep.mubr.msk.f32.mxu0 %vm366_vm3, %v354_v10  ;;  %vm343_vm5 = vcmp.lt.s32.totalorder %v1466_v26, 200  ;;  %vm344_vm7 = vcmp.lt.s32.totalorder %v1468_v28, 200  ;;  %vm345_vm9 = vcmp.lt.s32.totalorder %v1470_v31, 200 }
  0x1d   : > { %vm1227_vm8 = vmpackc.low %vm343_vm5, %vm342_vm4  ;;  %vm346_vm11 = vcmp.lt.s32.totalorder %v1482_v40, 200  ;;  %vm347_vm12 = vcmp.lt.s32.totalorder %v1484_v41, 200  ;;  %v1500_v54 = vadd.s32 %v333_v21, %v331_v45  ;;  %vm348_vm14 = vcmp.lt.s32.totalorder %v1498_v53, 200 }
  0x1e   : > { %1224 = vmatpush3.bf16.msra.mxu1 %v1221_v16  ;;  %vm1231_vm10 = vmpackc.low %vm345_vm9, %vm344_vm7 }
  0x1f   : > { %1162 = vmatmul.mubr.msk.f32.gmra.mrb[4].mxu0 %vm366_vm3, %v355_v11  ;;  %vm1235_vm13 = vmpackc.low %vm347_vm12, %vm346_vm11  ;;  %vm349_vm15 = vcmp.lt.s32.totalorder %v1500_v54, 200 }
  0x20   : > { %1164 = vmatprep.mubr.msk.f32.mxu0 %vm366_vm3, %v356_v12  ;;  %vm1239_vm0 = vmpackc.low %vm349_vm15, %vm348_vm14 }
  0x23   : > { %1165 = vmatmul.mubr.msk.f32.gmra.mrb[6].mxu0 %vm366_vm3, %v357_v13  ;;  %vm1353_vm3 = vmmov 0  }
  0xea   : > { %v1157_v27 = vpop.f32.mrb[0].mxu0 }
  0xeb   : > { %v467_v29 = vadd.f32 %v1157_v27, %v1083_v24  ;;  %v461_v30 = vpop.f32.mrb[1].mxu0 }
  0xec   : > { %v462_v34 = vadd.f32 %v1083_v24, %v461_v30 }
  0xed   : > { %v501_v35 = vmax.f32 %v467_v29, 0.0 }
  0xee   : > { %v500_v36 = vmax.f32 %v462_v34, 0.0  ;;  %v1160_v37 = vpop.f32.mrb[2].mxu0 }
  0xef   : > { %v477_v38 = vadd.f32 %v1160_v37, %v1083_v24  ;;  %v471_v39 = vpop.f32.mrb[3].mxu0 }
  0xf0   : > { %v1226_v42 = vpack.c.bf16 %v501_v35, %v500_v36  ;;  %v472_v43 = vadd.f32 %v1083_v24, %v471_v39  ;;  %1175 = vmatprep.mubr.msk.f32.mxu1 %vm519_vm6, %v500_v36 }
  0xf1   : > { %v503_v46 = vmax.f32 %v477_v38, 0.0  ;;  %1176 = vmatmul.mubr.msk.f32.vlgmr.msra.gmra.mrb[0].mxu1 %vm519_vm6, %v501_v35 }
  0xf2   : > { %v502_v47 = vmax.f32 %v472_v43, 0.0  ;;  %v1163_v48 = vpop.f32.mrb[4].mxu0  ;;  %1228 = vmatpush3.bf16.msk.msra.mxu0 %vm1227_vm8, %v1226_v42  ;;  %vm1027_vm8 = vcmask (!%p1112_p5), 8192  }
  0xf3   : > { %v487_v49 = vadd.f32 %v1163_v48, %v1083_v24  ;;  %v481_v50 = vpop.f32.mrb[5].mxu0  ;;  %1229 = vmatprep.subr.bf16.mxu0 %v1351_v17 }
  0xf4   : > { %v1230_v51 = vpack.c.bf16 %v503_v46, %v502_v47  ;;  %v482_v52 = vadd.f32 %v1083_v24, %v481_v50  ;;  %1178 = vmatprep.mubr.msk.f32.mxu1 %vm519_vm6, %v502_v47  ;;  %v1352_v50 = vmov 0  }
  0xf5   : > { %v505_v55 = vmax.f32 %v487_v49, 0.0  ;;  %1179 = vmatmul.mubr.msk.f32.gmra.mrb[2].mxu1 %vm519_vm6, %v503_v46  ;;  %1272 = vset.pattern.permute.xlu1 %v1352_v50 }
  0xf6   : > { %v504_v56 = vmax.f32 %v482_v52, 0.0  ;;  %v1166_v57 = vpop.f32.mrb[6].mxu0  ;;  %1232 = vmatpush3.bf16.msk.msra.mxu0 %vm1231_vm10, %v1230_v51 }
  0xf7   : > { %v497_v58 = vadd.f32 %v1166_v57, %v1083_v24  ;;  %v491_v59 = vpop.f32.mrb[7].mxu0  ;;  %1233 = vmatprep.subr.bf16.mxu0 %v1351_v17 }
  0xf8   : > { %v1234_v60 = vpack.c.bf16 %v505_v55, %v504_v56  ;;  %v492_v61 = vadd.f32 %v1083_v24, %v491_v59  ;;  %1181 = vmatprep.mubr.msk.f32.mxu1 %vm519_vm6, %v504_v56 }
  0xf9   : > { %v507_v62 = vmax.f32 %v497_v58, 0.0  ;;  %1182 = vmatmul.mubr.msk.f32.gmra.mrb[4].mxu1 %vm519_vm6, %v505_v55 }
  0xfa   : > { %v506_v63 = vmax.f32 %v492_v61, 0.0  ;;  %1236 = vmatpush3.bf16.msk.msra.mxu0 %vm1235_vm13, %v1234_v60 }
  0xfb   : > { %1237 = vmatprep.subr.bf16.mxu0 %v1351_v17 }
  0xfc   : > { %v1238_v0 = vpack.c.bf16 %v507_v62, %v506_v63  ;;  %1184 = vmatprep.mubr.msk.f32.mxu1 %vm519_vm6, %v506_v63 }
  0xfd   : > { %1185 = vmatmul.mubr.msk.f32.gmra.mrb[6].mxu1 %vm519_vm6, %v507_v62 }
  0xfe   : > { %1240 = vmatpush3.bf16.msk.msra.mxu0 %vm1239_vm0, %v1238_v0 }
 0x1c4   : > { %v1177_v2 = vpop.f32.mrb[0].mxu1 }
 0x1c5   : > { %v616_v3 = vadd.f32 %v1177_v2, %v1093_v1  ;;  %v610_v4 = vpop.f32.mrb[1].mxu1 }
 0x1c6   : > { %v611_v5 = vadd.f32 %v1093_v1, %v610_v4 }
 0x1c7   : > { %1274 = vtanh.f32 %v616_v3 }
 0x1c8   : > { %1276 = vtanh.f32 %v611_v5  ;;  %v1180_v6 = vpop.f32.mrb[2].mxu1 }
 0x1c9   : > { %v626_v7 = vadd.f32 %v1180_v6, %v1093_v1  ;;  %v620_v8 = vpop.f32.mrb[3].mxu1 }
 0x1ca   : > { %v621_v9 = vadd.f32 %v1093_v1, %v620_v8 }
 0x1cb   : > { %1278 = vtanh.f32 %v626_v7 }
 0x1cc   : > { %1280 = vtanh.f32 %v621_v9  ;;  %v1183_v10 = vpop.f32.mrb[4].mxu1 }
 0x1cd   : > { %v636_v11 = vadd.f32 %v1183_v10, %v1093_v1  ;;  %v630_v12 = vpop.f32.mrb[5].mxu1 }
 0x1ce   : > { %v631_v13 = vadd.f32 %v1093_v1, %v630_v12 }
 0x1cf   : > { %1282 = vtanh.f32 %v636_v11 }
 0x1d0   : > { %1284 = vtanh.f32 %v631_v13  ;;  %v1186_v15 = vpop.f32.mrb[6].mxu1 }
 0x1d1   : > { %v1275_v16 = vpop.eup %1274  ;;  %v646_v17 = vadd.f32 %v1186_v15, %v1093_v1  ;;  %v640_v18 = vpop.f32.mrb[7].mxu1 }
 0x1d2   : > { %v1277_v20 = vpop.eup %1276  ;;  %v641_v21 = vadd.f32 %v1093_v1, %v640_v18  ;;  %v665_v22 = vmul.f32 %v1275_v16, %v1102_v14 }
 0x1d3   : > { %1286 = vtanh.f32 %v646_v17  ;;  %v664_v24 = vmul.f32 %v1277_v20, %v1102_v14  ;;  %v704_v17 = vld [vmem:[#allocation2] sm:$0x1]  ;;  %v1551_v20 = vsub.s32 0, %v1454_v19 }
 0x1d4   : > { %1288 = vtanh.f32 %v641_v21  ;;  %v675_v23 = vsel %vm519_vm6, %v665_v22, 0.0 }
 0x1d5   : > { %v1279_v27 = vpop.eup %1278  ;;  %676 = vadd.xlane.f32.xlu0 %v675_v23  ;;  %v672_v33 = vsel %vm519_vm6, %v664_v24, 0.0 }
 0x1d6   : > { %v1281_v29 = vpop.eup %1280  ;;  %v667_v30 = vmul.f32 %v1279_v27, %v1102_v14 }
 0x1d7   : > { %v666_v34 = vmul.f32 %v1281_v29, %v1102_v14 }
 0x1d8   : > { %v681_v32 = vsel %vm519_vm6, %v667_v30, 0.0 }
 0x1d9   : > { %v1283_v35 = vpop.eup %1282  ;;  %682 = vadd.xlane.f32.xlu1 %v681_v32  ;;  %673 = vadd.xlane.f32.xlu0 %v672_v33  ;;  %v678_v38 = vsel %vm519_vm6, %v666_v34, 0.0 }
 0x1da   : > { %v1285_v36 = vpop.eup %1284  ;;  %v669_v39 = vmul.f32 %v1283_v35, %v1102_v14 }
 0x1db   : > { %v668_v37 = vmul.f32 %v1285_v36, %v1102_v14 }
 0x1dc   : > { %v687_v46 = vsel %vm519_vm6, %v669_v39, 0.0 }
 0x1dd   : > { %v1287_v42 = vpop.eup %1286  ;;  %679 = vadd.xlane.f32.xlu1 %v678_v38  ;;  %v684_v43 = vsel %vm519_vm6, %v668_v37, 0.0 }
 0x1de   : > { %v1289_v44 = vpop.eup %1288  ;;  %685 = vadd.xlane.f32.xlu0 %v684_v43  ;;  %v671_v47 = vmul.f32 %v1287_v42, %v1102_v14 }
 0x1df   : > { %v670_v45 = vmul.f32 %v1289_v44, %v1102_v14 }
 0x1e0   : > { %v693_v49 = vsel %vm519_vm6, %v671_v47, 0.0  ;;  %v1354_v47 = vmov 0.0  }
 0x1e1   : > { %688 = vadd.xlane.f32.xlu1 %v687_v46  ;;  %v690_v48 = vsel %vm519_vm6, %v670_v45, 0.0  ;;  %1203 = vmatprep.mubr.msk.f32.mxu0 %vm1353_vm3, %v1354_v47 }
 0x1e2   : > { %691 = vadd.xlane.f32.xlu0 %v690_v48 }
 0x1e5   : > { %694 = vadd.xlane.f32.xlu1 %v693_v49 }
 0x262   : > { %v677_v51 = vpop.xlane.xlu0 %676 }
 0x263   : > { %v697_v61 = vsel %vm343_vm5, %v677_v51, -inf }
 0x266   : > { %v683_v52 = vpop.xlane.xlu1 %682  ;;  %v674_v55 = vpop.xlane.xlu0 %673 }
 0x267   : > { %v699_v2 = vsel %vm345_vm9, %v683_v52, -inf  ;;  %v696_v3 = vsel %vm342_vm4, %v674_v55, -inf }
 0x26a   : > { %v680_v56 = vpop.xlane.xlu1 %679 }
 0x26b   : > { %v686_v57 = vpop.xlane.xlu0 %685  ;;  %v698_v4 = vsel %vm344_vm7, %v680_v56, -inf }
 0x26c   : > { %v700_v62 = vsel %vm346_vm11, %v686_v57, -inf }
 0x26d   : > { %v705_v6 = vmax.f32 %v696_v3, %v700_v62 }
 0x26e   : > { %v689_v58 = vpop.xlane.xlu1 %688 }
 0x26f   : > { %v701_v59 = vsel %vm347_vm12, %v689_v58, -inf  ;;  %v692_v60 = vpop.xlane.xlu0 %691 }
 0x270   : > { %v702_v63 = vsel %vm348_vm14, %v692_v60, -inf  ;;  %v706_v0 = vmax.f32 %v697_v61, %v701_v59 }
 0x271   : > { %v707_v7 = vmax.f32 %v698_v4, %v702_v63 }
 0x272   : > { %v695_v1 = vpop.xlane.xlu1 %694  ;;  %v709_v9 = vmax.f32 %v705_v6, %v706_v0 }
 0x273   : > { %v703_v5 = vsel %vm349_vm15, %v695_v1, -inf }
 0x274   : > { %v708_v8 = vmax.f32 %v699_v2, %v703_v5 }
 0x276   : > { %v710_v10 = vmax.f32 %v707_v7, %v708_v8 }
 0x278   : > { %v711_v11 = vmax.f32 %v709_v9, %v710_v10 }
 0x27a   : > { %v712_v12 = vrot.slane %v711_v11, 4 }
 0x27c   : > { %v713_v13 = vmax.f32 %v711_v11, %v712_v12 }
 0x27e   : > { %v714_v14 = vrot.slane %v713_v13, 2 }
 0x280   : > { %v715_v15 = vmax.f32 %v713_v13, %v714_v14 }
 0x282   : > { %v716_v16 = vrot.slane %v715_v15, 1 }
 0x284   : > { %v717_v18 = vmax.f32 %v715_v15, %v716_v16  ;;  %v784_v15 = vld [vmem:[#allocation3] sm:$0x1] }
 0x286   : > { %v718_v21 = vmax.f32 %v704_v17, %v717_v18 }
 0x288   : > { %v719_v22 = vsub.f32 %v704_v17, %v718_v21  ;;  %v726_v23 = vrot.slane %v718_v21, %v1551_v20  ;;  %931 = vst.msk [vmem:[#allocation2] sm:$0x1] %vm809_vm1, %v718_v21 }
 0x28a   : > { %v720_v24 = vmul.f32 1.442695, %v719_v22  ;;  %v728_v27 = vsub.f32 %v696_v3, %v726_v23  ;;  %v729_v29 = vsub.f32 %v697_v61, %v726_v23  ;;  %v730_v30 = vsub.f32 %v698_v4, %v726_v23 }
 0x28b   : > { %v731_v32 = vsub.f32 %v699_v2, %v726_v23  ;;  %v732_v33 = vsub.f32 %v700_v62, %v726_v23  ;;  %v733_v36 = vsub.f32 %v701_v59, %v726_v23  ;;  %v734_v38 = vsub.f32 %v702_v63, %v726_v23 }
 0x28c   : > { %1290 = vpow2.f32 %v720_v24  ;;  %v736_v34 = vmul.f32 1.442695, %v728_v27  ;;  %v738_v35 = vmul.f32 1.442695, %v729_v29  ;;  %v740_v37 = vmul.f32 1.442695, %v730_v30 }
 0x28d   : > { %v742_v19 = vmul.f32 1.442695, %v731_v32  ;;  %v744_v39 = vmul.f32 1.442695, %v732_v33  ;;  %v735_v42 = vsub.f32 %v703_v5, %v726_v23  ;;  %v746_v43 = vmul.f32 1.442695, %v733_v36 }
 0x28e   : > { %1292 = vpow2.f32 %v736_v34  ;;  %v748_v44 = vmul.f32 1.442695, %v734_v38  ;;  %v811_v24 = vld [vmem:[#allocation4] sm:$0x1]  ;;  %v950_v34 = vld [vmem:[%s1632_s6 + $0x8] sm:$0xff] (!%p1112_p5)  ;;  %v1356_v36 = vmov (!%p1112_p5), 0.0|0.0  }
 0x28f   : > { %1294 = vpow2.f32 %v738_v35  ;;  %v750_v45 = vmul.f32 1.442695, %v735_v42  ;;  %v1355_v35 = vmov (!%p1112_p5), 0   ;;  %1241 = vmatprep.subr.bf16.mxu0 (!%p1112_p5), %v1356_v36  ;;  %v952_v38 = vld [vmem:[%s1632_s6 + $0x18] sm:$0xff] (!%p1112_p5) }
 0x290   : > { %1296 = vpow2.f32 %v740_v37 }
 0x291   : > { %1298 = vpow2.f32 %v742_v19  ;;  %v951_v19 = vld [vmem:[%s1632_s6 + $0x10] sm:$0xff] (!%p1112_p5) }
 0x292   : > { %1300 = vpow2.f32 %v744_v39  ;;  %v1245_v42 = vpack.c.bf16 (!%p1112_p5), %v952_v38, %v951_v19 }
 0x293   : > { %1302 = vpow2.f32 %v746_v43  ;;  %v1358_v43 = vmov (!%p1112_p5), 0.0  }
 0x294   : > { %1304 = vpow2.f32 %v748_v44 }
 0x295   : > { %1306 = vpow2.f32 %v750_v45 }
 0x296   : > { %v1291_v46 = vpop.eup %1290 }
 0x297   : > { %814 = vperm.xlu1 %1272, %v1291_v46   ;;  %v785_v17 = vmul.f32 %v1291_v46, %v784_v15 }
 0x298   : > { %v1293_v48 = vpop.eup %1292 }
 0x299   : > { %v1295_v49 = vpop.eup %1294  ;;  %v752_v51 = vsel %vm342_vm4, %v1293_v48, 0.0  ;;  %vm854_vm4 = vcmask 523264   ;;  %v953_v48 = vld [vmem:[%s1633_s7] sm:$0x1] (!%p1112_p5) }
 0x29a   : > { %v1297_v52 = vpop.eup %1296  ;;  %822 = vxpose.xlu0.b32.start [1/8] (short) (narrow) %v752_v51, 8  ;;  %v787_v55 = vsel %vm786_vm2, %v752_v51, 0.0  ;;  %v753_v56 = vsel %vm343_vm5, %v1295_v49, 0.0  ;;  %vm929_vm5 = vcmask 253952  }
 0x29b   : > { %v1299_v57 = vpop.eup %1298  ;;  %v788_v58 = vsel %vm786_vm2, %v753_v56, 0.0  ;;  %v754_v59 = vsel %vm344_vm7, %v1297_v52, 0.0  ;;  %vm1357_vm7 = vmmov (!%p1112_p5), 0  }
 0x29c   : > { %v1301_v60 = vpop.eup %1300  ;;  %v789_v61 = vadd.f32 %v788_v58, %v787_v55  ;;  %v755_v62 = vsel %vm345_vm9, %v1299_v57, 0.0  ;;  %v790_v63 = vsel %vm786_vm2, %v754_v59, 0.0 }
 0x29d   : > { %v1303_v25 = vpop.eup %1302  ;;  %v756_v26 = vsel %vm346_vm11, %v1301_v60, 0.0  ;;  %v792_v2 = vsel %vm786_vm2, %v755_v62, 0.0 }
 0x29e   : > { %823 = vxpose.xlu0.b32.cont [2/8] (short) (narrow) %v753_v56, 8  ;;  %v791_v0 = vadd.f32 %v790_v63, %v789_v61  ;;  %v1305_v1 = vpop.eup %1304  ;;  %v757_v28 = vsel %vm347_vm12, %v1303_v25, 0.0  ;;  %v794_v5 = vsel %vm786_vm2, %v756_v26, 0.0 }
 0x29f   : > { %v1307_v4 = vpop.eup %1306  ;;  %v758_v6 = vsel %vm348_vm14, %v1305_v1, 0.0  ;;  %v796_v7 = vsel %vm786_vm2, %v757_v28, 0.0 }
 0x2a0   : > { %v793_v3 = vadd.f32 %v792_v2, %v791_v0  ;;  %v759_v40 = vsel %vm349_vm15, %v1307_v4, 0.0  ;;  %v798_v9 = vsel %vm786_vm2, %v758_v6, 0.0 }
 0x2a1   : > { %v800_v41 = vsel %vm786_vm2, %v759_v40, 0.0 }
 0x2a2   : > { %824 = vxpose.xlu0.b32.cont [3/8] (short) (narrow) %v754_v59, 8  ;;  %v795_v31 = vadd.f32 %v794_v5, %v793_v3 }
 0x2a4   : > { %v797_v8 = vadd.f32 %v796_v7, %v795_v31 }
 0x2a6   : > { %825 = vxpose.xlu0.b32.cont [4/8] (short) (narrow) %v755_v62, 8  ;;  %v799_v10 = vadd.f32 %v798_v9, %v797_v8 }
 0x2a8   : > { %v801_v11 = vadd.f32 %v800_v41, %v799_v10 }
 0x2aa   : > { %826 = vxpose.xlu0.b32.cont [5/8] (short) (narrow) %v756_v26, 8  ;;  %v802_v12 = vrot.slane %v801_v11, 4 }
 0x2ac   : > { %v803_v13 = vadd.f32 %v802_v12, %v801_v11 }
 0x2ae   : > { %827 = vxpose.xlu0.b32.cont [6/8] (short) (narrow) %v757_v28, 8  ;;  %v804_v14 = vrot.slane %v803_v13, 2 }
 0x2b0   : > { %v805_v53 = vadd.f32 %v804_v14, %v803_v13 }
 0x2b2   : > { %828 = vxpose.xlu0.b32.cont [7/8] (short) (narrow) %v758_v6, 8  ;;  %v806_v16 = vrot.slane %v805_v53, 1 }
 0x2b4   : > { %v807_v18 = vadd.f32 %v806_v16, %v805_v53 }
 0x2b6   : > { %829 = vxpose.xlu0.b32.end [8/8] (short) (narrow) %v759_v40, 8  ;;  %v808_v54 = vadd.f32 %v807_v18, %v785_v17 }
 0x2b8   : > { %810 = vst.msk [vmem:[#allocation3] sm:$0x1] %vm809_vm1, %v808_v54 }
 0x2bf   : > { %v937_v33 = vld [vmem:[#allocation3] sm:$0x1] (!%p1112_p5) }
 0x2c0   : > { %1309 = vrcp.f32 (!%p1112_p5), %v937_v33 }
 0x2ca   : > { %v1310_v39 = vpop.eup (!%p1112_p5), %1309 }
 0x2df   : > { %1273 = vset.pattern.permute.xlu0 %v1352_v50  ;;  %v949_v50 = vld [vmem:[%s1632_s6] sm:$0xff] (!%p1112_p5) }
 0x2e0   : > { %1308 = vset.pattern.permute.xlu0 (!%p1112_p5), %v1355_v35  ;;  %v1242_v37 = vpack.c.bf16 (!%p1112_p5), %v950_v34, %v949_v50 }
 0x2e1   : > { %941 = vperm.xlu0 (!%p1112_p5), %1308, %v1310_v39  }
 0x316   : > { %v815_v22 = vpop.permute.xlu1 %814 }
 0x317   : > { %v820_v23 = vrot.slane %v815_v22, %v1551_v20 }
 0x319   : > { %v821_v27 = vmul.f32 %v820_v23, %v811_v24 }
 0x31a   : > { %v838_v21 = vpop.trf.xlu0 }
 0x31b   : > { %1204 = vmatmul.mubr.msk.f32.vlgmr.msra.gmra.mrb[8].mxu0 %vm854_vm4, %v838_v21 }
 0x31c   : > { %1243 = vmatpush3.bf16.msra.mxu0 (!%p1112_p5), %v1242_v37  ;;  %1214 = vmatprep.mubr.msk.f32.mxu0 (!%p1112_p5), %vm1357_vm7, %v1358_v43 }
 0x31d   : > { %1244 = vmatprep.subr.bf16.mxu0 (!%p1112_p5), %v1356_v36 }
 0x320   : > { %1246 = vmatpush3.bf16.msra.mxu0 (!%p1112_p5), %v1245_v42 }
 0x360   : > { %v942_v44 = vpop.permute.xlu0 (!%p1112_p5), %941 }
 0x361   : > { %v947_v46 = vrot.slane (!%p1112_p5), %v942_v44, %v1551_v20 }
 0x3eb   : > { %935 = sbr.rel (%p1112_p5) target bundleno = 1234 (0x4d2), region = 60 }
 0x3ee   : > { %v924_v29 = vpop.f32.mrb[8].mxu0 }
 0x3ef   : > { %v928_v30 = vadd.f32 %v924_v29, %v821_v27  ;;  %v1205_v32 = vpop.f32.mrb[9].mxu0 }
 0x3f1   : > { %930 = vst.msk [vmem:[#allocation4] sm:$0x1] %vm929_vm5, %v928_v30 }
 0x3f8   : > { %v936_v45 = vld [vmem:[#allocation4] sm:$0x1] }
 0x3f9   : > { %v948_v47 = vmul.f32 %v947_v46, %v936_v45 }
 0x3fb   : > { %1215 = vmatmul.mubr.msk.f32.vlgmr.msra.gmra.mrb[0].mxu0 %vm519_vm6, %v948_v47 }
 0x4ce   : > { %v1023_v49 = vpop.f32.mrb[0].mxu0 }
 0x4cf   : > { %v1024_v51 = vadd.f32 %v1023_v49, %v953_v48  ;;  %v1216_v52 = vpop.f32.mrb[1].mxu0 }
 0x4d1   : > { %1028 = vst.msk [vmem:[#allocation5] sm:$0x1] %vm1027_vm8, %v1024_v51 }
 0x4d2 PF: > { %p1251_p6 = scmp.eq.s32.totalorder %s1411_s28, 3  ;;  %s1359_s19 = smov [#allocation5]  }
 0x4d3   : > { %s1036_s20 = sshll.u32 %s1359_s19, 4  ;;  %s1037_s20 = int_to_ptr.vmem [resolvable:$true] %s1036_s20 }
 0x4d4   : > { %s1311_s21 = scalar_lea.vmem %s1037_s20, 16  ;;  %s1317_s22 = scalar_lea.vmem %s1037_s20, 32 }
 0x4d5   : > { %p1312_p7 = scmp.ne.s32.totalorder %s1037_s20, %s1311_s21  ;;  %p1318_p10 = scmp.lt.s32.totalorder %s1037_s20, %s1037_s20 }
 0x4d6   : > { %p1319_p11 = scmp.lt.s32.totalorder %s1317_s22, %s1311_s21 }
 0x4d7   : > { %p1313_p8 = pnand %p1312_p7, %p1251_p6 }
 0x4d8   : > { %p1320_p12 = por %p1319_p11, %p1318_p10 }
 0x4d9   : > { %p1314_p9 = pneg %p1313_p8 }
 0x4db   : > { %p1321_p13 = pnand %p1320_p12, %p1314_p9 }
 0x4dd   : > { %1324 = shalt.err (!%p1321_p13)
}
 0x4de   : > { %s1325_s25 = scalar_lea.hbm %s1634_s8, 16 }
 0x4df   : > { %p1326_p0 = scmp.ne.s32.totalorder %s1634_s8, %s1325_s25  ;;  %p1331_p3 = scmp.lt.u32.totalorder %s1325_s25, %s1634_s8 }
 0x4e1   : > { %p1327_p1 = pnand %p1326_p0, %p1251_p6 }
 0x4e3   : > { %p1328_p2 = pneg %p1327_p1 }
 0x4e5   : > { %p1333_p4 = pnand %p1331_p3, %p1328_p2 }
 0x4e7   : > { %1336 = shalt.err (!%p1333_p4)
}
 0x4e8   : > { %1248 = dma.vmem_to_hbm [thread:$0]  (%p1251_p6), %s1037_s20, 16, %s1634_s8, [#allocation6]  }
 0x4e9   : > { %1342 = dma.done.wait (%p1251_p6), [#allocation6], 16  }
 0x4ea   : > { %1344 = vsyncadd (%p1251_p6), [#allocation6], 4294967280 }
 0x4eb PF: > { %s19_s27 = sadd.s32 1, %s1347_s27  }
 0x4ec   : > { %p16_p5 = scmp.ge.s32.totalorder %s19_s27, 6  }
 0x4ee   :  { %18 = sbr.rel (!%p16_p5) target bundleno = 1 (0x1), region = 87 }
 0x4f5   :  { %1049 = vsyncpa [#allocation6], 1 }
 0x4f6   :  { %1051 = vsyncpa [#allocation6 + $0x1], 1 }

</bundles_post_ra>
